<compile_context>
chip_gen: v5e
topology: v5e:2x2
jax: 0.10.0
libtpu: 0.0.40
codegen_flags: <defaults>
</compile_context>

<pallas_src>
import functools

import jax
import jax.numpy as jnp
from jax import lax
from jax.experimental import pallas as pl
from jax.experimental.pallas import tpu as pltpu

# Scoped-VMEM request: leaves headroom on v7x (64 MiB/TC physical); v5e/v6e
# have 128 MiB physical so this is comfortably safe there too.
VMEM_LIMIT_BYTES = 48 * 1024 * 1024


def _choose_tile_p(C, HW, itemsize):
    # Per-step live VMEM ~= 2 * pred tile (double buffer, input dtype)
    #                     + ~3 * (C, tile_p) 32-bit temporaries (compares/selects
    #                       widen to 32-bit even for bf16 inputs, esp. on v5e).
    # Keep that under ~half of the scoped-VMEM request.
    bytes_per_elem = 2 * itemsize + 3 * 4
    tile = (VMEM_LIMIT_BYTES // 2) // max(1, C * bytes_per_elem)
    tile = (tile // 128) * 128
    tile = max(128, min(32768, tile))
    if tile >= HW:
        return HW          # one full-extent pixel block: no trailing padding at all
    return tile


def _iou_count_kernel(pred_ref, tgt_ref, inter_ref, union_ref, *,
                      hw, tile_p, tiles_per_split, need_mask):
    s = pl.program_id(0)               # core-split index
    p = pl.program_id(2)               # pixel-tile index within the split

    # Fresh accumulators at the first pixel tile of each (split, image).
    @pl.when(p == 0)
    def _():
        inter_ref[...] = jnp.zeros_like(inter_ref)
        union_ref[...] = jnp.zeros_like(union_ref)

    pred = pred_ref[0]                                     # (C, TILE_P), input dtype
    tgt = tgt_ref[0].astype(jnp.int32)                     # (1, TILE_P)
    C = pred.shape[0]

    # argmax over classes (first-occurrence tie break); softmax not needed.
    cls_ids = lax.broadcasted_iota(jnp.int32, (C, 1), 0)   # (C, 1), broadcast below
    pred_max = jnp.max(pred, axis=0, keepdims=True)        # (1, TILE_P)
    cand = jnp.where(pred == pred_max, cls_ids, jnp.int32(C))
    pred_cls = jnp.min(cand, axis=0, keepdims=True)        # (1, TILE_P)

    if need_mask:
        # Lanes past the true pixel count (trailing partial block and, when the
        # pixel tiles don't split evenly across the core axis, whole duplicated
        # tiles) hold undefined data: force both operands to the invalid class
        # C so they contribute to neither inter nor union.
        t = s * tiles_per_split + p                        # logical pixel tile
        col = t * tile_p + lax.broadcasted_iota(jnp.int32, (1, tile_p), 1)
        lane_valid = col < hw
        pred_cls = jnp.where(lane_valid, pred_cls, jnp.int32(C))
        tgt = jnp.where(lane_valid, tgt, jnp.int32(C))

    pred_inds = pred_cls == cls_ids                        # (C, TILE_P)
    tgt_inds = tgt == cls_ids                              # (C, TILE_P)
    match = pred_cls == tgt                                # (1, TILE_P)

    inter_mask = jnp.logical_and(tgt_inds, match)          # pred==c & tgt==c
    union_mask = jnp.logical_or(pred_inds, tgt_inds)       # pred==c | tgt==c

    inter_ref[0, 0] = inter_ref[0, 0] + jnp.sum(
        inter_mask.astype(jnp.int32), axis=1, keepdims=True)
    union_ref[0, 0] = union_ref[0, 0] + jnp.sum(
        union_mask.astype(jnp.int32), axis=1, keepdims=True)


def iou_loss(pred, target, *, eps=1e-6, loss_weight=1.0, tile_p=None):
    """pred: (N, C, H, W) float logits; target: (N, H, W) int. Scalar f32 loss."""
    N, C, H, W = pred.shape
    HW = H * W
    itemsize = jnp.dtype(pred.dtype).itemsize
    if tile_p is None:
        tile_p = _choose_tile_p(C, HW, itemsize)
    num_tiles = pl.cdiv(HW, tile_p)

    # Leading 'parallel' core-split axis: with N odd (incl. N==1), megacore
    # sharding over N alone leaves a v7x TensorCore idle / imbalanced.
    n_splits = 2 if (N % 2 == 1 and num_tiles >= 2) else 1
    tiles_per_split = pl.cdiv(num_tiles, n_splits)
    need_mask = (n_splits * tiles_per_split * tile_p) != HW
    last_tile = num_tiles - 1

    # Free reshapes only — no transpose, no pad, no dtype change of the big tensor.
    pred3 = pred.reshape(N, C, HW)
    # TODO(synk): when C <= 127 the streamed target could be narrowed to int8
    # (widen in-kernel) to cut its HBM bytes ~4x; kept int32 for lowering safety.
    tgt3 = target.astype(jnp.int32).reshape(N, 1, HW)

    kernel = functools.partial(_iou_count_kernel, hw=HW, tile_p=tile_p,
                               tiles_per_split=tiles_per_split,
                               need_mask=need_mask)

    def _pix_idx(s, n, p):
        # Clamp so duplicated tiles (when num_tiles doesn't split evenly across
        # the core axis) re-read the last real tile; their lanes are fully
        # masked in-kernel, so they contribute nothing.
        return (n, 0, jnp.minimum(s * tiles_per_split + p, last_tile))

    inter, union_cnt = pl.pallas_call(
        kernel,
        out_shape=(jax.ShapeDtypeStruct((n_splits, N, C, 1), jnp.int32),
                   jax.ShapeDtypeStruct((n_splits, N, C, 1), jnp.int32)),
        grid_spec=pltpu.PrefetchScalarGridSpec(
            num_scalar_prefetch=0,
            grid=(n_splits, N, tiles_per_split),
            in_specs=[
                pl.BlockSpec((1, C, tile_p), _pix_idx),
                pl.BlockSpec((1, 1, tile_p), _pix_idx),
            ],
            out_specs=(
                pl.BlockSpec((1, 1, C, 1), lambda s, n, p: (s, n, 0, 0)),
                pl.BlockSpec((1, 1, C, 1), lambda s, n, p: (s, n, 0, 0)),
            ),
        ),
        compiler_params=pltpu.CompilerParams(
            dimension_semantics=("parallel", "parallel", "arbitrary"),
            vmem_limit_bytes=VMEM_LIMIT_BYTES,
        ),
    )(pred3, tgt3)

    # O(C) epilogue in plain JAX: combine exact integer counts, mean IoU.
    inter = jnp.sum(inter[:, :, :, 0], axis=(0, 1))            # (C,) int32
    union_cnt = jnp.sum(union_cnt[:, :, :, 0], axis=(0, 1))    # (C,) int32
    valid = union_cnt > 0            # class present in pred or target => union > eps
    ious = jnp.where(
        valid,
        inter.astype(jnp.float32) / (union_cnt.astype(jnp.float32) + eps),
        0.0)
    # NOTE: the PyTorch reference divides by len(ious) and would fail when no
    # class is present at all; the max(., 1) guard returns 0.0 in that case.
    den = jnp.maximum(jnp.sum(valid.astype(jnp.float32)), 1.0)
    return (jnp.float32(loss_weight) * jnp.sum(ious) / den).astype(jnp.float32)


def _reference(pred, target, eps=1e-6, loss_weight=1.0):
    # Pure-JAX reference of the PyTorch semantics, for a sanity check.
    C = pred.shape[1]
    pred_cls = jnp.argmax(pred, axis=1)
    tgt = target.astype(jnp.int32)
    ious, valids = [], []
    for c in range(C):
        pi = pred_cls == c
        ti = tgt == c
        inter = jnp.sum(jnp.logical_and(pi, ti).astype(jnp.float32))
        union_cnt = jnp.sum(jnp.logical_or(pi, ti).astype(jnp.float32))
        valids.append((union_cnt > 0).astype(jnp.float32))
        ious.append(jnp.where(union_cnt > 0, inter / (union_cnt + eps), 0.0))
    ious = jnp.stack(ious)
    valids = jnp.stack(valids)
    return loss_weight * jnp.sum(ious) / jnp.sum(valids)


if __name__ == "__main__":
    key = jax.random.PRNGKey(0)
    k = jax.random.split(key, 8)

    # Case 1: lane-aligned pixel count, even N (single tile, no core split).
    N, C, H, W = 2, 4, 16, 16
    pred = jax.random.normal(k[0], (N, C, H, W), dtype=jnp.float32)
    target = jax.random.randint(k[1], (N, H, W), 0, C, dtype=jnp.int32)
    loss = iou_loss(pred, target, eps=1e-6, loss_weight=1.0)
    jax.block_until_ready(loss)
    ref = _reference(pred, target, eps=1e-6, loss_weight=1.0)
    assert jnp.allclose(loss, ref, rtol=1e-5, atol=1e-6), (loss, ref)

    # Case 2: ragged pixel count smaller than a lane tile (full-extent block).
    pred2 = jax.random.normal(k[2], (1, 3, 7, 9), dtype=jnp.float32)
    target2 = jax.random.randint(k[3], (1, 7, 9), 0, 3, dtype=jnp.int32)
    loss2 = iou_loss(pred2, target2, eps=1e-6, loss_weight=0.5)
    jax.block_until_ready(loss2)
    ref2 = _reference(pred2, target2, eps=1e-6, loss_weight=0.5)
    assert jnp.allclose(loss2, ref2, rtol=1e-5, atol=1e-6), (loss2, ref2)

    # Case 3: odd N => core-split axis, ragged pixels, one duplicated (fully
    # masked) tile. tile_p forced small so several tiles exist at toy sizes.
    pred3 = jax.random.normal(k[4], (1, 3, 17, 19), dtype=jnp.float32)
    target3 = jax.random.randint(k[5], (1, 17, 19), 0, 3, dtype=jnp.int32)
    loss3 = iou_loss(pred3, target3, eps=1e-6, loss_weight=1.0, tile_p=128)
    jax.block_until_ready(loss3)
    ref3 = _reference(pred3, target3, eps=1e-6, loss_weight=1.0)
    assert jnp.allclose(loss3, ref3, rtol=1e-5, atol=1e-6), (loss3, ref3)

    # Case 4: even N, multiple pixel tiles with a trailing partial block.
    pred4 = jax.random.normal(k[6], (2, 5, 15, 25), dtype=jnp.float32)
    target4 = jax.random.randint(k[7], (2, 15, 25), 0, 5, dtype=jnp.int32)
    loss4 = iou_loss(pred4, target4, eps=1e-6, loss_weight=1.0, tile_p=128)
    jax.block_until_ready(loss4)
    ref4 = _reference(pred4, target4, eps=1e-6, loss_weight=1.0)
    assert jnp.allclose(loss4, ref4, rtol=1e-5, atol=1e-6), (loss4, ref4)

    print("KERNEL_OK")
</pallas_src>

<mosaic_0001>
module attributes {stable_mosaic.version = 11 : i64} {
  func.func @_iou_count_kernel(%arg0: i32, %arg1: i32, %arg2: i32, %arg3: memref<1x4x256xf32, #tpu.memory_space<vmem>>, %arg4: memref<1x1x256xi32, #tpu.memory_space<vmem>>, %arg5: memref<1x1x4x1xi32, #tpu.memory_space<vmem>>, %arg6: memref<1x1x4x1xi32, #tpu.memory_space<vmem>>) attributes {dimension_semantics = [#tpu.dimension_semantics<parallel>, #tpu.dimension_semantics<parallel>, #tpu.dimension_semantics<arbitrary>], iteration_bounds = array<i64: 1, 2, 1>, scalar_prefetch = 0 : i64, scratch_operands = 0 : i64, tpu.core_type = #tpu.core_type<tc>, window_params = [{transform_indices = @transform_0, window_bounds = array<i64: 1, 4, 256>}, {transform_indices = @transform_1, window_bounds = array<i64: 1, 1, 256>}, {transform_indices = @transform_2, window_bounds = array<i64: 1, 1, 4, 1>}, {transform_indices = @transform_3, window_bounds = array<i64: 1, 1, 4, 1>}]} {
    %c0_i32 = arith.constant 0 : i32
    %0 = arith.cmpi eq, %arg2, %c0_i32 : i32
    %1 = arith.extui %0 : i1 to i32
    %c0_i32_0 = arith.constant 0 : i32
    %2 = arith.cmpi ne, %1, %c0_i32_0 : i32
    scf.if %2 {
      %c0_i32_25 = arith.constant 0 : i32
      %46 = vector.broadcast %c0_i32_25 : i32 to vector<1x1x4x1xi32>
      %c0_26 = arith.constant 0 : index
      %c0_27 = arith.constant 0 : index
      %c0_28 = arith.constant 0 : index
      %c0_29 = arith.constant 0 : index
      %47 = vector.load %arg5[%c0_26, %c0_27, %c0_28, %c0_29] : memref<1x1x4x1xi32, #tpu.memory_space<vmem>>, vector<1x1x4x1xi32>
      tpu.vector_store %arg5[%c0_26, %c0_27, %c0_28, %c0_29], %46 {strides = array<i32>} : memref<1x1x4x1xi32, #tpu.memory_space<vmem>>, vector<1x1x4x1xi32>,
      %c0_i32_30 = arith.constant 0 : i32
      %48 = vector.broadcast %c0_i32_30 : i32 to vector<1x1x4x1xi32>
      %c0_31 = arith.constant 0 : index
      %c0_32 = arith.constant 0 : index
      %c0_33 = arith.constant 0 : index
      %c0_34 = arith.constant 0 : index
      %49 = vector.load %arg6[%c0_31, %c0_32, %c0_33, %c0_34] : memref<1x1x4x1xi32, #tpu.memory_space<vmem>>, vector<1x1x4x1xi32>
      tpu.vector_store %arg6[%c0_31, %c0_32, %c0_33, %c0_34], %48 {strides = array<i32>} : memref<1x1x4x1xi32, #tpu.memory_space<vmem>>, vector<1x1x4x1xi32>,
    } else {
    }
    %c0 = arith.constant 0 : index
    %c0_1 = arith.constant 0 : index
    %c0_2 = arith.constant 0 : index
    %3 = vector.load %arg3[%c0, %c0_1, %c0_2] : memref<1x4x256xf32, #tpu.memory_space<vmem>>, vector<1x4x256xf32>
    %4 = vector.shape_cast %3 : vector<1x4x256xf32> to vector<4x256xf32>
    %c0_3 = arith.constant 0 : index
    %c0_4 = arith.constant 0 : index
    %c0_5 = arith.constant 0 : index
    %5 = vector.load %arg4[%c0_3, %c0_4, %c0_5] : memref<1x1x256xi32, #tpu.memory_space<vmem>>, vector<1x1x256xi32>
    %6 = vector.shape_cast %5 : vector<1x1x256xi32> to vector<1x256xi32>
    %7 = tpu.iota {dimensions = array<i32: 0>} : vector<4x1xi32>
    %cst = arith.constant dense<0xFF800000> : vector<256xf32>
    %8 = vector.multi_reduction <maximumf>, %4, %cst [0] : vector<4x256xf32> to vector<256xf32>
    %9 = vector.shape_cast %8 : vector<256xf32> to vector<1x256xf32>
    %10 = vector.broadcast %9 : vector<1x256xf32> to vector<4x256xf32>
    %11 = arith.cmpf oeq, %4, %10 : vector<4x256xf32>
    %c4_i32 = arith.constant 4 : i32
    %12 = vector.shape_cast %7 : vector<4x1xi32> to vector<4x1xi32>
    %13 = vector.broadcast %12 : vector<4x1xi32> to vector<4x256xi32>
    %14 = vector.broadcast %c4_i32 : i32 to vector<4x256xi32>
    %15 = arith.select %11, %13, %14 : vector<4x256xi1>, vector<4x256xi32>
    %cst_6 = arith.constant dense<2147483647> : vector<256xi32>
    %16 = vector.multi_reduction <minsi>, %15, %cst_6 [0] : vector<4x256xi32> to vector<256xi32>
    %17 = vector.shape_cast %16 : vector<256xi32> to vector<1x256xi32>
    %18 = vector.broadcast %17 : vector<1x256xi32> to vector<4x256xi32>
    %19 = vector.broadcast %7 : vector<4x1xi32> to vector<4x256xi32>
    %20 = arith.cmpi eq, %18, %19 : vector<4x256xi32>
    %21 = vector.broadcast %6 : vector<1x256xi32> to vector<4x256xi32>
    %22 = vector.broadcast %7 : vector<4x1xi32> to vector<4x256xi32>
    %23 = arith.cmpi eq, %21, %22 : vector<4x256xi32>
    %24 = arith.cmpi eq, %17, %6 : vector<1x256xi32>
    %25 = vector.broadcast %24 : vector<1x256xi1> to vector<4x256xi1>
    %26 = arith.andi %23, %25 : vector<4x256xi1>
    %27 = arith.ori %20, %23 : vector<4x256xi1>
    %c0_7 = arith.constant 0 : index
    %c0_8 = arith.constant 0 : index
    %c0_9 = arith.constant 0 : index
    %c0_10 = arith.constant 0 : index
    %28 = vector.load %arg5[%c0_7, %c0_8, %c0_9, %c0_10] : memref<1x1x4x1xi32, #tpu.memory_space<vmem>>, vector<1x1x4x1xi32>
    %29 = vector.shape_cast %28 : vector<1x1x4x1xi32> to vector<4x1xi32>
    %30 = arith.extui %26 : vector<4x256xi1> to vector<4x256xi32>
    %cst_11 = arith.constant dense<0> : vector<4xi32>
    %31 = vector.multi_reduction <add>, %30, %cst_11 [1] : vector<4x256xi32> to vector<4xi32>
    %32 = vector.shape_cast %31 : vector<4xi32> to vector<4x1xi32>
    %33 = arith.addi %29, %32 : vector<4x1xi32>
    %c0_12 = arith.constant 0 : index
    %c0_13 = arith.constant 0 : index
    %c0_14 = arith.constant 0 : index
    %c0_15 = arith.constant 0 : index
    %34 = vector.load %arg5[%c0_12, %c0_13, %c0_14, %c0_15] : memref<1x1x4x1xi32, #tpu.memory_space<vmem>>, vector<1x1x4x1xi32>
    %35 = vector.shape_cast %34 : vector<1x1x4x1xi32> to vector<4x1xi32>
    %36 = vector.shape_cast %33 : vector<4x1xi32> to vector<1x1x4x1xi32>
    tpu.vector_store %arg5[%c0_12, %c0_13, %c0_14, %c0_15], %36 {strides = array<i32>} : memref<1x1x4x1xi32, #tpu.memory_space<vmem>>, vector<1x1x4x1xi32>,
    %c0_16 = arith.constant 0 : index
    %c0_17 = arith.constant 0 : index
    %c0_18 = arith.constant 0 : index
    %c0_19 = arith.constant 0 : index
    %37 = vector.load %arg6[%c0_16, %c0_17, %c0_18, %c0_19] : memref<1x1x4x1xi32, #tpu.memory_space<vmem>>, vector<1x1x4x1xi32>
    %38 = vector.shape_cast %37 : vector<1x1x4x1xi32> to vector<4x1xi32>
    %39 = arith.extui %27 : vector<4x256xi1> to vector<4x256xi32>
    %cst_20 = arith.constant dense<0> : vector<4xi32>
    %40 = vector.multi_reduction <add>, %39, %cst_20 [1] : vector<4x256xi32> to vector<4xi32>
    %41 = vector.shape_cast %40 : vector<4xi32> to vector<4x1xi32>
    %42 = arith.addi %38, %41 : vector<4x1xi32>
    %c0_21 = arith.constant 0 : index
    %c0_22 = arith.constant 0 : index
    %c0_23 = arith.constant 0 : index
    %c0_24 = arith.constant 0 : index
    %43 = vector.load %arg6[%c0_21, %c0_22, %c0_23, %c0_24] : memref<1x1x4x1xi32, #tpu.memory_space<vmem>>, vector<1x1x4x1xi32>
    %44 = vector.shape_cast %43 : vector<1x1x4x1xi32> to vector<4x1xi32>
    %45 = vector.shape_cast %42 : vector<4x1xi32> to vector<1x1x4x1xi32>
    tpu.vector_store %arg6[%c0_21, %c0_22, %c0_23, %c0_24], %45 {strides = array<i32>} : memref<1x1x4x1xi32, #tpu.memory_space<vmem>>, vector<1x1x4x1xi32>,
    return
  }
  func.func @transform_0(%arg0: i32, %arg1: i32, %arg2: i32) -> (i32, i32, i32) {
    %c1_i32 = arith.constant 1 : i32
    %0 = arith.muli %arg0, %c1_i32 : i32
    %1 = arith.addi %0, %arg2 : i32
    %c0_i32 = arith.constant 0 : i32
    %2 = arith.minsi %1, %c0_i32 : i32
    %c0_i32_0 = arith.constant 0 : i32
    %c0_i32_1 = arith.constant 0 : i32
    return %arg1, %c0_i32_0, %2 : i32, i32, i32
  }
  func.func @transform_1(%arg0: i32, %arg1: i32, %arg2: i32) -> (i32, i32, i32) {
    %c1_i32 = arith.constant 1 : i32
    %0 = arith.muli %arg0, %c1_i32 : i32
    %1 = arith.addi %0, %arg2 : i32
    %c0_i32 = arith.constant 0 : i32
    %2 = arith.minsi %1, %c0_i32 : i32
    %c0_i32_0 = arith.constant 0 : i32
    %c0_i32_1 = arith.constant 0 : i32
    return %arg1, %c0_i32_0, %2 : i32, i32, i32
  }
  func.func @transform_2(%arg0: i32, %arg1: i32, %arg2: i32) -> (i32, i32, i32, i32) {
    %c0_i32 = arith.constant 0 : i32
    %c0_i32_0 = arith.constant 0 : i32
    %c0_i32_1 = arith.constant 0 : i32
    return %arg0, %arg1, %c0_i32, %c0_i32_0 : i32, i32, i32, i32
  }
  func.func @transform_3(%arg0: i32, %arg1: i32, %arg2: i32) -> (i32, i32, i32, i32) {
    %c0_i32 = arith.constant 0 : i32
    %c0_i32_0 = arith.constant 0 : i32
    %c0_i32_1 = arith.constant 0 : i32
    return %arg0, %arg1, %c0_i32, %c0_i32_0 : i32, i32, i32, i32
  }
}

</mosaic_0001>

<bundles_post_ra>
// kernel: tpu_custom_call.1
= control target key start
LH: loop header
LB: loop body
LE: loop exit
PB: predicated region body
PF: predicated region fallthrough
CT: control target
= control target key end

     0   :  { %9 = vsyncpa [#allocation3], 0  ;;  %s960_s0 = inlined_call_operand.hbm [shape: f32[2,4,256], index: 0, kind: input, shape index: {}]   ;;  %s961_s1 = inlined_call_operand.hbm [shape: s32[2,1,256], index: 1, kind: input, shape index: {}]   ;;  %s962_s2 = inlined_call_operand.vmem [shape: s32[1,2,4,1], index: 2, kind: output, shape index: {0}]   ;;  %s963_s3 = inlined_call_operand.vmem [shape: s32[1,2,4,1], index: 3, kind: output, shape index: {1}]  }
   0x1   :  { %11 = vsyncpa [#allocation3 + $0x1], 0 }
   0x2   :  { %12 = vsyncpa [#allocation5], 0 }
   0x3   :  { %14 = vsyncpa [#allocation5 + $0x1], 0  ;;  %s821_s12 = smov 0   ;;  %s823_s13 = smov 0  }
   0x4   :  { %s825_s14 = smov 0   ;;  %s827_s15 = smov 0  }
   0x5   :  { %s829_s16 = smov 0   ;;  %s831_s17 = smov 0  }
   0x6 LB: > { %s604_s18 = sadd.s32 4294967295, %s797_s17   ;;  %s35_s19 = sadd.s32 1, %s793_s16  ;;  %s797_s17 = sphi %s831_s17, %s20_s17   ;;  %s793_s16 = sphi %s829_s16, %s975_s16   ;;  %s789_s15 = sphi %s827_s15, %s974_s15   ;;  %s785_s14 = sphi %s825_s14, %s973_s14   ;;  %s781_s13 = sphi %s823_s13, %s972_s13   ;;  %s777_s12 = sphi %s821_s12, %s971_s12  }
   0x7   : > { %p37_p0 = scmp.ge.s32.totalorder %s35_s19, 2  ;;  %s54_s20 = sadd.s32 1, %s785_s14 }
   0x8   : > { %p61_p1 = scmp.ne.s32.totalorder %s785_s14, %s781_s13  ;;  %p62_p2 = scmp.eq.s32.totalorder %s797_s17, 0 }
   0x9   : > { %s977_s19 = smov (%p37_p0, %s35_s19), 0  ;;  %p67_p4 = scmp.ne.s32.totalorder %s781_s13, %s777_s12 }
   0xa   : > { %p857_p3 = por %p62_p2, %p61_p1  ;;  %s49_s22 = ssub.s32 %s793_s16, %s977_s19 }
   0xb   : > { %p68_p5 = scmp.eq.s32.totalorder %s604_s18, 0  ;;  %p52_p6 = scmp.eq.s32.totalorder %s49_s22, 0 }
   0xc   : > { %p632_p8 = scmp.lt.s32.totalorder %s797_s17, 2  ;;  %s181_s25 = sand.u32 1, %s785_s14  }
   0xd   : > { %p864_p7 = por %p68_p5, %p67_p4  ;;  %s620_s26 = sshll.u32 %s793_s16, 3 }
   0xe   : > { %s870_s24 = scalar_select %p52_p6, %s785_s14, %s54_s20  }
   0xf   : > { %s608_s27 = sshll.u32 %s181_s25, 3  ;;  %s195_s30 = scalar_lea.hbm %s960_s0, %s620_s26 }
  0x10   : > { %s197_s4 = sshll.u32 %s195_s30, 4  ;;  %s185_s5 = scalar_lea.vmem [#allocation2], %s608_s27  ;;  %s198_s4 = int_to_ptr.hbm [resolvable:$true] %s197_s4 }
  0x11   : > { %s199_s6 = sshll.u32 %s185_s5, 4  ;;  %p879_p9 = pnand %p632_p8, %p857_p3  ;;  %s200_s6 = int_to_ptr.vmem [resolvable:$true] %s199_s6 }
  0x12   : > { %p613_p10 = scmp.ge.s32.totalorder %s797_s17, 1  ;;  %p228_p11 = scmp.lt.s32.totalorder %s797_s17, 3 }
  0x13   : > { %s611_s8 = sshll.u32 %s181_s25, 1  ;;  %s182_s9 = scalar_lea.sflag [#allocation3], %s181_s25 }
  0x14   : > { %628 = dma.hbm_to_vmem [thread:$0]  (!%p879_p9), %s198_s4, 128, %s200_s6, %s182_s9  }
  0x15   : > { %p229_p12 = pnand %p613_p10, %p228_p11  ;;  %s612_s10 = sshll.u32 %s793_s16, 1 }
  0x16   : > { %s210_s11 = scalar_lea.vmem [#allocation4], %s611_s8  ;;  %s219_s21 = scalar_lea.hbm %s961_s1, %s612_s10 }
  0x17   : > { %s223_s12 = sshll.u32 %s210_s11, 4  ;;  %s221_s22 = sshll.u32 %s219_s21, 4  ;;  %s224_s12 = int_to_ptr.vmem [resolvable:$true] %s223_s12  ;;  %s222_s22 = int_to_ptr.hbm [resolvable:$true] %s221_s22 }
  0x18   : > { %s207_s26 = scalar_lea.sflag [#allocation5], %s181_s25  ;;  %232 = sbr.rel (%p229_p12) target bundleno = 229 (0xe5), region = 28 }
  0x19   : > { %631 = dma.hbm_to_vmem [thread:$0]  (!%p879_p9), %s222_s22, 32, %s224_s12, %s207_s26  }
  0x1a   : > { %s234_s27 = sand.u32 (!%p229_p12), 1, %s781_s13  }
  0x1b   : > { %s614_s28 = sshll.u32 (!%p229_p12), %s234_s27, 3  ;;  %s235_s29 = scalar_lea.sflag (!%p229_p12), [#allocation3], %s234_s27 }
  0x1c   : > { %s238_s30 = scalar_lea.vmem (!%p229_p12), [#allocation2], %s614_s28 }
  0x1d   : > { %768 = dma.done.wait (%p864_p7), %s235_s29, 128  }
  0x1e   : > { %770 = vsyncadd (%p864_p7), %s235_s29, 4294967168  ;;  %s615_s4 = sshll.u32 %s234_s27, 1  ;;  %s245_s5 = scalar_lea.sflag [#allocation5], %s234_s27 }
  0x1f   : > { %s898_s6 = scalar_lea.vmem [#allocation4], %s615_s4 }
  0x20   : > { %772 = dma.done.wait (%p864_p7), %s245_s5, 32  }
  0x21   : > { %774 = vsyncadd (%p864_p7), %s245_s5, 4294967264  ;;  %v319_v0 = vld [vmem:[%s238_s30] sm:$0xff]  ;;  %vm329_vm0 = vcmask 1043456   ;;  %v321_v9 = vlaneseq  ;;  %v799_v12 = vmov 839922192   ;;  %v800_v47 = vmov 0  }
  0x22   : > { %324 = vst [vmem:[#allocation1] ss:$2 sm:$0xff] %v319_v0  ;;  %v351_v13 = vunpack.c.l.s4 %v799_v12  ;;  %v320_v36 = vld [vmem:[%s898_s6] sm:$0x3]  ;;  %p298_p13 = scmp.lt.s32.totalorder %s789_s15, 1 }
  0x23   : > { %v322_v16 = vshrl.u32 %v321_v9, 7  ;;  %v380_v41 = vperm.slane %v320_v36, 0  ;;  %v381_v42 = vperm.slane %v320_v36, 1 }
  0x24   : > { %v352_v19 = vunpack.c.0.s8 %v351_v13  ;;  %s979_s15 = smov (!%p298_p13, %s789_s15), 1 }
  0x25   : > { %vm910_vm8 = vcmp.eq.s32.totalorder %v380_v41, %v322_v16  ;;  %vm914_vm13 = vcmp.eq.s32.totalorder %v381_v42, %v322_v16  ;;  %s616_s23 = sshll.u32 %s979_s15, 2 }
  0x26   : > { %v353_v23 = vperm.slane %v322_v16, %v352_v19  ;;  %s303_s8 = scalar_lea.vmem %s962_s2, %s616_s23  ;;  %s311_s11 = scalar_lea.vmem %s963_s3, %s616_s23 }
  0x29   : > { %v325_v1 = vld.sshfl [vmem:[#allocation1] sm:$0xff pattern:$0x75316420]  ;;  %v326_v2 = vld.sshfl [vmem:[#allocation1 + $0x8] sm:$0xff pattern:$0x75316420] }
  0x2a   : > { %v330_v3 = vsel %vm329_vm0, %v325_v1, -inf  ;;  %v337_v4 = vsel %vm329_vm0, %v326_v2, -inf }
  0x2b   : > { %v331_v5 = vrot.slane %v330_v3, 4  ;;  %v338_v6 = vrot.slane %v337_v4, 4 }
  0x2d   : > { %v332_v7 = vmax.f32 %v330_v3, %v331_v5  ;;  %v339_v8 = vmax.f32 %v337_v4, %v338_v6 }
  0x2f   : > { %v333_v10 = vrot.slane %v332_v7, 2  ;;  %v340_v11 = vrot.slane %v339_v8, 2 }
  0x31   : > { %v334_v14 = vmax.f32 %v332_v7, %v333_v10  ;;  %v341_v15 = vmax.f32 %v339_v8, %v340_v11 }
  0x33   : > { %v335_v17 = vrot.slane %v334_v14, 1  ;;  %v342_v18 = vrot.slane %v341_v15, 1 }
  0x35   : > { %v336_v20 = vmax.f32 %v334_v14, %v335_v17  ;;  %v343_v21 = vmax.f32 %v341_v15, %v342_v18 }
  0x37   : > { %v346_v22 = vrot.slane %v343_v21, 4 }
  0x39   : > { %v347_v24 = vsel %vm329_vm0, %v336_v20, %v346_v22 }
  0x3a   : > { %vm349_vm1 = vcmp.eq.f32.partialorder %v319_v0, %v347_v24 }
  0x3b   : > { %v354_v25 = vsel %vm349_vm1, %v353_v23, 4 }
  0x3c   : > { %355 = vst [vmem:[#allocation1] ss:$2 sm:$0xff] %v354_v25 }
  0x43   : > { %v356_v26 = vld.sshfl [vmem:[#allocation1] sm:$0xff pattern:$0x75316420]  ;;  %v357_v27 = vld.sshfl [vmem:[#allocation1 + $0x8] sm:$0xff pattern:$0x75316420] }
  0x44   : > { %v358_v28 = vsel %vm329_vm0, %v356_v26, 2147483647  ;;  %v368_v29 = vsel %vm329_vm0, %v357_v27, 2147483647 }
  0x45   : > { %v359_v30 = vrot.slane %v358_v28, 4  ;;  %v369_v31 = vrot.slane %v368_v29, 4 }
  0x47   : > { %vm360_vm2 = vcmp.lt.s32.totalorder %v358_v28, %v359_v30  ;;  %vm370_vm3 = vcmp.lt.s32.totalorder %v368_v29, %v369_v31 }
  0x48   : > { %v361_v32 = vsel %vm360_vm2, %v358_v28, %v359_v30  ;;  %v371_v33 = vsel %vm370_vm3, %v368_v29, %v369_v31 }
  0x49   : > { %v362_v34 = vrot.slane %v361_v32, 2  ;;  %v372_v35 = vrot.slane %v371_v33, 2 }
  0x4b   : > { %vm363_vm4 = vcmp.lt.s32.totalorder %v361_v32, %v362_v34  ;;  %vm373_vm5 = vcmp.lt.s32.totalorder %v371_v33, %v372_v35 }
  0x4c   : > { %v364_v37 = vsel %vm363_vm4, %v361_v32, %v362_v34  ;;  %v374_v38 = vsel %vm373_vm5, %v371_v33, %v372_v35 }
  0x4d   : > { %v365_v39 = vrot.slane %v364_v37, 1  ;;  %v375_v40 = vrot.slane %v374_v38, 1 }
  0x4f   : > { %vm366_vm6 = vcmp.lt.s32.totalorder %v364_v37, %v365_v39  ;;  %vm376_vm7 = vcmp.lt.s32.totalorder %v374_v38, %v375_v40 }
  0x50   : > { %v367_v43 = vsel %vm366_vm6, %v364_v37, %v365_v39  ;;  %v377_v44 = vsel %vm376_vm7, %v374_v38, %v375_v40 }
  0x51   : > { %vm384_vm9 = vcmp.eq.s32.totalorder %v367_v43, %v380_v41  ;;  %vm385_vm10 = vcmp.eq.s32.totalorder %v377_v44, %v381_v42  ;;  %vm378_vm11 = vcmp.eq.s32.totalorder %v367_v43, %v322_v16  ;;  %vm379_vm12 = vcmp.eq.s32.totalorder %v377_v44, %v322_v16 }
  0x52   : > { %v386_v48 = vsel %vm384_vm9, 1, %v800_v47  ;;  %v387_v49 = vsel %vm385_vm10, 1, %v800_v47  ;;  %vm394_vm14 = vmor %vm378_vm11, %vm910_vm8 }
  0x53   : > { %v388_v50 = vperm.slane %v386_v48, 0  ;;  %v389_v51 = vperm.slane %v387_v49, 0  ;;  %vm395_vm15 = vmor %vm379_vm12, %vm914_vm13  ;;  %v418_v52 = vsel %vm394_vm14, 1, %v800_v47 }
  0x54   : > { %v419_v53 = vsel %vm395_vm15, 1, %v800_v47  ;;  %v420_v58 = vsel %vm329_vm0, %v418_v52, 0 }
  0x55   : > { %vm390_vm1 = vcmp.eq.s32.totalorder %v388_v50, 1  ;;  %vm391_vm2 = vcmp.eq.s32.totalorder %v389_v51, 1  ;;  %v421_v59 = vsel %vm329_vm0, %v419_v53, 0 }
  0x56   : > { %vm392_vm3 = vmand %vm910_vm8, %vm390_vm1  ;;  %v422_v63 = vadd.s32 %v421_v59, %v420_v58 }
  0x57   : > { %vm393_vm4 = vmand %vm914_vm13, %vm391_vm2  ;;  %v397_v54 = vsel %vm392_vm3, 1, %v800_v47 }
  0x58   : > { %v398_v55 = vsel %vm393_vm4, 1, %v800_v47  ;;  %v399_v56 = vsel %vm329_vm0, %v397_v54, 0  ;;  %v424_v2 = vshrl.u32 %v422_v63, 16  ;;  %v423_v3 = vand.u32 65535, %v422_v63 }
  0x59   : > { %v400_v57 = vsel %vm329_vm0, %v398_v55, 0  ;;  %vm316_vm0 = vcmask 3072  }
  0x5a   : > { %v401_v60 = vadd.s32 %v400_v57, %v399_v56  ;;  %v426_v4 = vcvt.s32.f32 %v424_v2  ;;  %v425_v5 = vcvt.s32.f32 %v423_v3  ;;  %317 = vst.msk [vmem:[%s303_s8] sm:$0xf] %vm316_vm0, %v800_v47 }
  0x5b   : > { %318 = vst.msk [vmem:[%s311_s11] sm:$0xf] %vm316_vm0, %v800_v47 }
  0x5c   : > { %v403_v61 = vshrl.u32 %v401_v60, 16  ;;  %v402_v62 = vand.u32 65535, %v401_v60 }
  0x5e   : > { %v405_v0 = vcvt.s32.f32 %v403_v61  ;;  %v404_v1 = vcvt.s32.f32 %v402_v62 }
  0x60   : > { %408 = vadd.xlane.f32.xlu0 %v405_v0  ;;  %406 = vadd.xlane.f32.xlu1 %v404_v1 }
  0x61   : > { %v396_v11 = vld [vmem:[%s303_s8] sm:$0xf] }
  0x62   : > { %v417_v19 = vld [vmem:[%s311_s11] sm:$0xf] }
  0x68   : > { %429 = vadd.xlane.f32.xlu0 %v426_v4  ;;  %427 = vadd.xlane.f32.xlu1 %v425_v5 }
  0xd3   : > { %v409_v6 = vpop.xlane.xlu0 %408  ;;  %v407_v7 = vpop.xlane.xlu1 %406 }
  0xd4   : > { %v411_v8 = vcvt.f32.s32 %v409_v6  ;;  %v410_v9 = vcvt.f32.s32 %v407_v7 }
  0xd6   : > { %v412_v10 = vshll.u32 %v411_v8, 16 }
  0xd8   : > { %v413_v12 = vadd.s32 %v412_v10, %v410_v9 }
  0xda   : > { %v414_v13 = vadd.s32 %v413_v12, %v396_v11 }
  0xdb   : > { %v430_v14 = vpop.xlane.xlu0 %429  ;;  %v428_v15 = vpop.xlane.xlu1 %427 }
  0xdc   : > { %416 = vst.msk [vmem:[%s303_s8] sm:$0xf] %vm316_vm0, %v414_v13  ;;  %v432_v16 = vcvt.f32.s32 %v430_v14  ;;  %v431_v17 = vcvt.f32.s32 %v428_v15 }
  0xde   : > { %v433_v18 = vshll.u32 %v432_v16, 16 }
  0xe0   : > { %v434_v20 = vadd.s32 %v433_v18, %v431_v17 }
  0xe2   : > { %v435_v21 = vadd.s32 %v434_v20, %v417_v19 }
  0xe4   : > { %436 = vst.msk [vmem:[%s311_s11] sm:$0xf] %vm316_vm0, %v435_v21 }
  0xe5 PF: > { %s20_s17 = sadd.s32 1, %s797_s17   ;;  %s971_s12 = smov %s781_s13 }
  0xe6   : > { %p17_p0 = scmp.ge.s32.totalorder %s20_s17, 4   ;;  %s972_s13 = smov %s785_s14 }
  0xe7   : > { %s973_s14 = smov %s870_s24  ;;  %s974_s15 = smov %s793_s16 }
  0xe8   : > { %s975_s16 = smov %s977_s19  ;;  %19 = sbr.rel (!%p17_p0) target bundleno = 6 (0x6), region = 97 }
  0xed   :  { %486 = vsyncpa [#allocation3], 1 }
  0xee   :  { %488 = vsyncpa [#allocation3 + $0x1], 1 }
  0xef   :  { %489 = vsyncpa [#allocation5], 1 }
  0xf0   :  { %491 = vsyncpa [#allocation5 + $0x1], 1 }

</bundles_post_ra>
